<compile_context>
chip_gen: v5e
topology: v5e:2x2
jax: 0.10.0
libtpu: 0.0.40
codegen_flags: <defaults>
</compile_context>

<pallas_src>
import jax
import jax.numpy as jnp
from jax.experimental import pallas as pl
from jax.experimental.pallas import tpu as pltpu

BLOCK = 2                 # i-RevNet block_size (fixed in the module)
BLOCK_SQ = BLOCK * BLOCK  # block_size ** 2


def _route_copy_kernel(x_ref, o_ref):
    # x_ref: (1, tH, W, 2s)   = channel half i of the input rows
    # o_ref: (1, tH, 1, W, 2s) = output rows of parity i (view of (N, 2H, 2W, s))
    # Identical element order -> plain copy; all routing is done by the BlockSpec DMAs.
    o_ref[0, :, 0, :, :] = x_ref[0]


def _lane_slice_kernel(x_ref, o_ref):
    # x_ref: (1, tH, W, C) with C = 4s ; o_ref: (1, tH, 2, W, 2s)
    # out[h, i, w, j*s + sd] = x[h, w, (2i + j)*s + sd]  -> two static lane slices.
    x = x_ref[0]
    half = x.shape[-1] // 2          # = 2s
    o_ref[0, :, 0, :, :] = x[:, :, :half]   # even output rows (i = 0)
    o_ref[0, :, 1, :, :] = x[:, :, half:]   # odd output rows  (i = 1)


def _padded_vmem_bytes(shape, itemsize):
    """Conservative VMEM footprint of a block: last two dims padded to (8, 128)."""
    *lead, r, c = shape
    rp = -(-r // 8) * 8
    cp = -(-c // 128) * 128
    n = itemsize * rp * cp
    for d in lead:
        n *= d
    return n


def _choose_tile_h(H, per_row_bytes, budget_bytes):
    """Largest divisor of H whose in+out block pair fits the (single-buffer) budget."""
    tH = 1
    for t in range(1, H + 1):
        if H % t == 0 and t * per_row_bytes <= budget_bytes:
            tH = t
    return tH


def i_revnet_upsampling_nhwc(x):
    """NHWC-native core: (N, H, W, C) -> (N, 2H, 2W, C//4)."""
    N, H, W, C = x.shape
    assert C % BLOCK_SQ == 0, "channel count must be divisible by 4"
    s = C // BLOCK_SQ
    half = BLOCK * s                                  # 2s: channel half / output row width /W
    itemsize = jnp.dtype(x.dtype).itemsize

    total_bytes = N * H * W * C * itemsize
    cost = pl.CostEstimate(flops=0, transcendentals=0, bytes_accessed=2 * total_bytes)

    # Output viewed as (N, H, 2, W, 2s): memory-identical to (N, 2H, 2W, s).
    out_view = (N, H, BLOCK, W, half)
    aligned = (half % 128 == 0)

    if aligned:
        per_row = (_padded_vmem_bytes((W, half), itemsize)
                   + _padded_vmem_bytes((1, W, half), itemsize))
    else:
        per_row = (_padded_vmem_bytes((W, C), itemsize)
                   + _padded_vmem_bytes((BLOCK, W, half), itemsize))
    tH = _choose_tile_h(H, per_row, 2 * 1024 * 1024)  # ~2 MiB per in+out block pair
    nH = H // tH

    if aligned:
        # Pure DMA routing: grid axis i selects the channel half <-> output row parity.
        out_v = pl.pallas_call(
            _route_copy_kernel,
            out_shape=jax.ShapeDtypeStruct(out_view, x.dtype),
            grid_spec=pltpu.PrefetchScalarGridSpec(
                num_scalar_prefetch=0,
                grid=(N, nH, BLOCK),
                in_specs=[pl.BlockSpec((1, tH, W, half),
                                       lambda n, h, i: (n, h, 0, i))],
                out_specs=pl.BlockSpec((1, tH, 1, W, half),
                                       lambda n, h, i: (n, h, i, 0, 0)),
            ),
            compiler_params=pltpu.CompilerParams(
                dimension_semantics=("parallel", "parallel", "parallel")),
            cost_estimate=cost,
        )(x)
    else:
        # General case (2s not a multiple of 128): full-C input blocks, two lane slices.
        out_v = pl.pallas_call(
            _lane_slice_kernel,
            out_shape=jax.ShapeDtypeStruct(out_view, x.dtype),
            grid_spec=pltpu.PrefetchScalarGridSpec(
                num_scalar_prefetch=0,
                grid=(N, nH),
                in_specs=[pl.BlockSpec((1, tH, W, C),
                                       lambda n, h: (n, h, 0, 0))],
                out_specs=pl.BlockSpec((1, tH, BLOCK, W, half),
                                       lambda n, h: (n, h, 0, 0, 0)),
            ),
            compiler_params=pltpu.CompilerParams(
                dimension_semantics=("parallel", "parallel")),
            cost_estimate=cost,
        )(x)

    # Free view change: (N, H, 2, W, 2s) and (N, 2H, 2W, s) share the same memory order.
    return out_v.reshape(N, BLOCK * H, BLOCK * W, s)


def i_revnet_upsampling(xs):
    """Pallas equivalent of i_revnet_upsampling.forward(xs, rev=False). NCHW in/out."""
    # TODO(synk): rev=True (space-to-depth) branch is not implemented; only the forward path.
    x = xs[0]
    N, C, H, W = x.shape
    assert C % BLOCK_SQ == 0, "channel count must be divisible by 4"
    # Glue: each transpose below is a full HBM read+write pass. If the surrounding model
    # runs NHWC, call i_revnet_upsampling_nhwc directly and skip both.
    x_nhwc = jnp.transpose(x, (0, 2, 3, 1))
    out_nhwc = i_revnet_upsampling_nhwc(x_nhwc)
    return [jnp.transpose(out_nhwc, (0, 3, 1, 2))]


def _reference(x):
    """Pure-JAX transcription of the torch code path (for self-check)."""
    N, C, H, W = x.shape
    s = C // BLOCK_SQ
    y = x.reshape(N, BLOCK, BLOCK, s, H, W)          # [n, i, j, sd, h, w]
    y = jnp.transpose(y, (0, 3, 4, 1, 5, 2))         # [n, sd, h, i, w, j]
    return y.reshape(N, s, BLOCK * H, BLOCK * W)


if __name__ == "__main__":
    key = jax.random.PRNGKey(0)
    cases = [
        (2, 4, 16, 16),    # small (s=1): lane-slice path
        (1, 8, 8, 16),     # non-square spatial (s=2): lane-slice path
        (2, 256, 8, 8),    # 2s = 128: pure DMA-routing path
    ]
    ok = True
    for idx, shape in enumerate(cases):
        k = jax.random.fold_in(key, idx)
        x = jax.random.normal(k, shape, dtype=jnp.float32)
        out = jax.block_until_ready(i_revnet_upsampling([x])[0])
        ref = _reference(x)
        N, C, H, W = shape
        assert out.shape == (N, C // 4, 2 * H, 2 * W), (shape, out.shape)
        assert out.dtype == x.dtype
        ok = ok and bool(jnp.allclose(out, ref))
    assert ok, "Pallas kernel output mismatch vs reference"
    print("KERNEL_OK")
</pallas_src>

<mosaic_0001>
module attributes {stable_mosaic.version = 11 : i64} {
  func.func @_lane_slice_kernel(%arg0: i32, %arg1: i32, %arg2: memref<1x16x16x4xf32, #tpu.memory_space<vmem>>, %arg3: memref<1x16x2x16x2xf32, #tpu.memory_space<vmem>>) attributes {dimension_semantics = [#tpu.dimension_semantics<parallel>, #tpu.dimension_semantics<parallel>], iteration_bounds = array<i64: 2, 1>, scalar_prefetch = 0 : i64, scratch_operands = 0 : i64, tpu.core_type = #tpu.core_type<tc>, window_params = [{transform_indices = @transform_0, window_bounds = array<i64: 1, 16, 16, 4>}, {transform_indices = @transform_1, window_bounds = array<i64: 1, 16, 2, 16, 2>}]} {
    %c0 = arith.constant 0 : index
    %c0_0 = arith.constant 0 : index
    %c0_1 = arith.constant 0 : index
    %c0_2 = arith.constant 0 : index
    %0 = vector.load %arg2[%c0, %c0_0, %c0_1, %c0_2] : memref<1x16x16x4xf32, #tpu.memory_space<vmem>>, vector<1x16x16x4xf32>
    %1 = vector.shape_cast %0 : vector<1x16x16x4xf32> to vector<16x16x4xf32>
    %2 = vector.extract_strided_slice %1 {offsets = [0, 0, 0], sizes = [16, 16, 2], strides = [1, 1, 1]} : vector<16x16x4xf32> to vector<16x16x2xf32>
    %c0_3 = arith.constant 0 : index
    %c0_4 = arith.constant 0 : index
    %c0_5 = arith.constant 0 : index
    %c0_6 = arith.constant 0 : index
    %c0_7 = arith.constant 0 : index
    %3 = vector.load %arg3[%c0_3, %c0_4, %c0_5, %c0_6, %c0_7] : memref<1x16x2x16x2xf32, #tpu.memory_space<vmem>>, vector<1x16x1x16x2xf32>
    %4 = vector.shape_cast %3 : vector<1x16x1x16x2xf32> to vector<16x16x2xf32>
    %5 = vector.shape_cast %2 : vector<16x16x2xf32> to vector<1x16x1x16x2xf32>
    tpu.vector_store %arg3[%c0_3, %c0_4, %c0_5, %c0_6, %c0_7], %5 {strides = array<i32>} : memref<1x16x2x16x2xf32, #tpu.memory_space<vmem>>, vector<1x16x1x16x2xf32>,
    %6 = vector.extract_strided_slice %1 {offsets = [0, 0, 2], sizes = [16, 16, 2], strides = [1, 1, 1]} : vector<16x16x4xf32> to vector<16x16x2xf32>
    %c0_8 = arith.constant 0 : index
    %c0_9 = arith.constant 0 : index
    %c1 = arith.constant 1 : index
    %c0_10 = arith.constant 0 : index
    %c0_11 = arith.constant 0 : index
    %7 = vector.load %arg3[%c0_8, %c0_9, %c1, %c0_10, %c0_11] : memref<1x16x2x16x2xf32, #tpu.memory_space<vmem>>, vector<1x16x1x16x2xf32>
    %8 = vector.shape_cast %7 : vector<1x16x1x16x2xf32> to vector<16x16x2xf32>
    %9 = vector.shape_cast %6 : vector<16x16x2xf32> to vector<1x16x1x16x2xf32>
    tpu.vector_store %arg3[%c0_8, %c0_9, %c1, %c0_10, %c0_11], %9 {strides = array<i32>} : memref<1x16x2x16x2xf32, #tpu.memory_space<vmem>>, vector<1x16x1x16x2xf32>,
    return
  }
  func.func @transform_0(%arg0: i32, %arg1: i32) -> (i32, i32, i32, i32) {
    %c0_i32 = arith.constant 0 : i32
    %c0_i32_0 = arith.constant 0 : i32
    %c0_i32_1 = arith.constant 0 : i32
    return %arg0, %arg1, %c0_i32, %c0_i32_0 : i32, i32, i32, i32
  }
  func.func @transform_1(%arg0: i32, %arg1: i32) -> (i32, i32, i32, i32, i32) {
    %c0_i32 = arith.constant 0 : i32
    %c0_i32_0 = arith.constant 0 : i32
    %c0_i32_1 = arith.constant 0 : i32
    %c0_i32_2 = arith.constant 0 : i32
    return %arg0, %arg1, %c0_i32, %c0_i32_0, %c0_i32_1 : i32, i32, i32, i32, i32
  }
}

</mosaic_0001>

<bundles_post_ra>
// kernel: tpu_custom_call.1
= control target key start
LH: loop header
LB: loop body
LE: loop exit
PB: predicated region body
PF: predicated region fallthrough
CT: control target
= control target key end

     0   :  { %s588_s6 = smov 0   ;;  %s590_s7 = smov 0   ;;  %s817_s0 = inlined_call_operand.vmem [shape: f32[2,16,16,4], index: 0, kind: input, shape index: {}]   ;;  %s818_s1 = inlined_call_operand.vmem [shape: f32[2,16,2,16,2], index: 1, kind: output, shape index: {}]  }
   0x1   :  { %s592_s8 = smov 0  }
   0x2 LB: > { %s23_s9 = sadd.s32 1, %s571_s7  ;;  %p487_p0 = scmp.ge.s32.totalorder %s575_s8, 1  ;;  %s575_s8 = sphi %s592_s8, %s11_s8   ;;  %s571_s7 = sphi %s590_s7, %s820_s7   ;;  %s567_s6 = sphi %s588_s6, %s819_s6  }
   0x3   : > { %p25_p1 = scmp.ge.s32.totalorder %s23_s9, 2  ;;  %p109_p2 = scmp.lt.s32.totalorder %s575_s8, 3 }
   0x5   : > { %s822_s9 = smov (%p25_p1, %s23_s9), 0  ;;  %p110_p3 = pnand %p487_p0, %p109_p2 }
   0x6   : > { %p140_p4 = scmp.lt.s32.totalorder (!%p110_p3), %s567_s6, 1  ;;  %s577_s18 = smov (!%p110_p3), 126  }
   0x7   : > { %113 = sbr.rel (%p110_p3) target bundleno = 213 (0xd5), region = 24 }
   0xc   : > { %s824_s6 = smov (!%p140_p4, %s567_s6), 1  ;;  %vm193_vm0 = vcmask 15360  }
   0xd   : > { %s526_s10 = sshll.u32 %s824_s6, 8  ;;  %s527_s11 = sshll.u32 %s824_s6, 9 }
   0xe   : > { %s609_s14 = scalar_lea.vmem %s817_s0, %s526_s10  ;;  %s614_s17 = scalar_lea.vmem %s818_s1, %s527_s11 }
   0xf   : > { %v163_v0 = vld [vmem:[%s609_s14 + $0x10] sm:$0xff]  ;;  %v161_v1 = vld [vmem:[%s609_s14] sm:$0xff]  ;;  %v164_v2 = vld [vmem:[%s609_s14 + $0x18] sm:$0xff] }
  0x10   : > { %262 = vrot.lane.b32.xlu1 %v163_v0, %s577_s18  ;;  %196 = vst.msk [vmem:[%s614_s17 + $0x20] sm:$0xff] %vm193_vm0, %v163_v0  ;;  %258 = vrot.lane.b32.xlu0 %v161_v1, %s577_s18  ;;  %v162_v3 = vld [vmem:[%s609_s14 + $0x8] sm:$0xff] }
  0x11   : > { %194 = vst.msk [vmem:[%s614_s17] sm:$0xff] %vm193_vm0, %v161_v1  ;;  %v165_v4 = vld [vmem:[%s609_s14 + $0x20] sm:$0xff]  ;;  %v168_v5 = vld [vmem:[%s609_s14 + $0x38] sm:$0xff]  ;;  %v167_v6 = vld [vmem:[%s609_s14 + $0x30] sm:$0xff] }
  0x12   : > { %197 = vst.msk [vmem:[%s614_s17 + $0x28] sm:$0xff] %vm193_vm0, %v164_v2  ;;  %266 = vrot.lane.b32.xlu2 %v165_v4, %s577_s18  ;;  %v171_v7 = vld [vmem:[%s609_s14 + $0x50] sm:$0xff]  ;;  %v170_v8 = vld [vmem:[%s609_s14 + $0x48] sm:$0xff] }
  0x13   : > { %195 = vst.msk [vmem:[%s614_s17 + $0x8] sm:$0xff] %vm193_vm0, %v162_v3  ;;  %v174_v9 = vld [vmem:[%s609_s14 + $0x68] sm:$0xff]  ;;  %v173_v11 = vld [vmem:[%s609_s14 + $0x60] sm:$0xff]  ;;  %v176_v13 = vld [vmem:[%s609_s14 + $0x78] sm:$0xff] }
  0x14   : > { %201 = vst.msk [vmem:[%s614_s17 + $0x68] sm:$0xff] %vm193_vm0, %v168_v5  ;;  %v166_v10 = vld [vmem:[%s609_s14 + $0x28] sm:$0xff]  ;;  %v177_v12 = vld [vmem:[%s609_s14 + $0x80] sm:$0xff]  ;;  %v180_v15 = vld [vmem:[%s609_s14 + $0x98] sm:$0xff] }
  0x15   : > { %200 = vst.msk [vmem:[%s614_s17 + $0x60] sm:$0xff] %vm193_vm0, %v167_v6  ;;  %v169_v14 = vld [vmem:[%s609_s14 + $0x40] sm:$0xff]  ;;  %v179_v16 = vld [vmem:[%s609_s14 + $0x90] sm:$0xff]  ;;  %v172_v17 = vld [vmem:[%s609_s14 + $0x58] sm:$0xff] }
  0x16   : > { %204 = vst.msk [vmem:[%s614_s17 + $0xa0] sm:$0xff] %vm193_vm0, %v171_v7  ;;  %v183_v18 = vld [vmem:[%s609_s14 + $0xb0] sm:$0xff]  ;;  %v182_v19 = vld [vmem:[%s609_s14 + $0xa8] sm:$0xff]  ;;  %v185_v22 = vld [vmem:[%s609_s14 + $0xc0] sm:$0xff] }
  0x17   : > { %203 = vst.msk [vmem:[%s614_s17 + $0x88] sm:$0xff] %vm193_vm0, %v170_v8  ;;  %v175_v20 = vld [vmem:[%s609_s14 + $0x70] sm:$0xff]  ;;  %v186_v21 = vld [vmem:[%s609_s14 + $0xc8] sm:$0xff]  ;;  %v189_v24 = vld [vmem:[%s609_s14 + $0xe0] sm:$0xff] }
  0x18   : > { %264 = vrot.lane.b32.xlu1 %v164_v2, %s577_s18  ;;  %260 = vrot.lane.b32.xlu0 %v162_v3, %s577_s18  ;;  %198 = vst.msk [vmem:[%s614_s17 + $0x40] sm:$0xff] %vm193_vm0, %v165_v4  ;;  %v178_v23 = vld [vmem:[%s609_s14 + $0x88] sm:$0xff] }
  0x19   : > { %207 = vst.msk [vmem:[%s614_s17 + $0xc8] sm:$0xff] %vm193_vm0, %v174_v9  ;;  %v188_v25 = vld [vmem:[%s609_s14 + $0xd8] sm:$0xff]  ;;  %v181_v26 = vld [vmem:[%s609_s14 + $0xa0] sm:$0xff]  ;;  %v191_v28 = vld [vmem:[%s609_s14 + $0xf0] sm:$0xff] }
  0x1a   : > { %206 = vst.msk [vmem:[%s614_s17 + $0xc0] sm:$0xff] %vm193_vm0, %v173_v11  ;;  %268 = vrot.lane.b32.xlu2 %v166_v10, %s577_s18  ;;  %v192_v27 = vld [vmem:[%s609_s14 + $0xf8] sm:$0xff]  ;;  %v187_v30 = vld [vmem:[%s609_s14 + $0xd0] sm:$0xff] }
  0x1b   : > { %199 = vst.msk [vmem:[%s614_s17 + $0x48] sm:$0xff] %vm193_vm0, %v166_v10  ;;  %v184_v29 = vld [vmem:[%s609_s14 + $0xb8] sm:$0xff]  ;;  %v190_v31 = vld [vmem:[%s609_s14 + $0xe8] sm:$0xff] }
  0x1c   : > { %210 = vst.msk [vmem:[%s614_s17 + $0x100] sm:$0xff] %vm193_vm0, %v177_v12 }
  0x1d   : > { %209 = vst.msk [vmem:[%s614_s17 + $0xe8] sm:$0xff] %vm193_vm0, %v176_v13 }
  0x1e   : > { %202 = vst.msk [vmem:[%s614_s17 + $0x80] sm:$0xff] %vm193_vm0, %v169_v14 }
  0x1f   : > { %213 = vst.msk [vmem:[%s614_s17 + $0x128] sm:$0xff] %vm193_vm0, %v180_v15 }
  0x20   : > { %272 = vrot.lane.b32.xlu1 %v168_v5, %s577_s18  ;;  %270 = vrot.lane.b32.xlu0 %v167_v6, %s577_s18  ;;  %212 = vst.msk [vmem:[%s614_s17 + $0x120] sm:$0xff] %vm193_vm0, %v179_v16 }
  0x21   : > { %205 = vst.msk [vmem:[%s614_s17 + $0xa8] sm:$0xff] %vm193_vm0, %v172_v17 }
  0x22   : > { %216 = vst.msk [vmem:[%s614_s17 + $0x160] sm:$0xff] %vm193_vm0, %v183_v18  ;;  %274 = vrot.lane.b32.xlu2 %v169_v14, %s577_s18 }
  0x23   : > { %215 = vst.msk [vmem:[%s614_s17 + $0x148] sm:$0xff] %vm193_vm0, %v182_v19 }
  0x24   : > { %208 = vst.msk [vmem:[%s614_s17 + $0xe0] sm:$0xff] %vm193_vm0, %v175_v20 }
  0x25   : > { %219 = vst.msk [vmem:[%s614_s17 + $0x188] sm:$0xff] %vm193_vm0, %v186_v21 }
  0x26   : > { %218 = vst.msk [vmem:[%s614_s17 + $0x180] sm:$0xff] %vm193_vm0, %v185_v22 }
  0x27   : > { %211 = vst.msk [vmem:[%s614_s17 + $0x108] sm:$0xff] %vm193_vm0, %v178_v23 }
  0x28   : > { %278 = vrot.lane.b32.xlu1 %v171_v7, %s577_s18  ;;  %276 = vrot.lane.b32.xlu0 %v170_v8, %s577_s18  ;;  %222 = vst.msk [vmem:[%s614_s17 + $0x1c0] sm:$0xff] %vm193_vm0, %v189_v24 }
  0x29   : > { %221 = vst.msk [vmem:[%s614_s17 + $0x1a8] sm:$0xff] %vm193_vm0, %v188_v25 }
  0x2a   : > { %280 = vrot.lane.b32.xlu2 %v172_v17, %s577_s18  ;;  %214 = vst.msk [vmem:[%s614_s17 + $0x140] sm:$0xff] %vm193_vm0, %v181_v26 }
  0x2b   : > { %225 = vst.msk [vmem:[%s614_s17 + $0x1e8] sm:$0xff] %vm193_vm0, %v192_v27 }
  0x2c   : > { %224 = vst.msk [vmem:[%s614_s17 + $0x1e0] sm:$0xff] %vm193_vm0, %v191_v28 }
  0x2d   : > { %217 = vst.msk [vmem:[%s614_s17 + $0x168] sm:$0xff] %vm193_vm0, %v184_v29 }
  0x2e   : > { %220 = vst.msk [vmem:[%s614_s17 + $0x1a0] sm:$0xff] %vm193_vm0, %v187_v30 }
  0x2f   : > { %223 = vst.msk [vmem:[%s614_s17 + $0x1c8] sm:$0xff] %vm193_vm0, %v190_v31 }
  0x30   : > { %284 = vrot.lane.b32.xlu1 %v174_v9, %s577_s18  ;;  %282 = vrot.lane.b32.xlu0 %v173_v11, %s577_s18 }
  0x32   : > { %286 = vrot.lane.b32.xlu2 %v175_v20, %s577_s18 }
  0x38   : > { %290 = vrot.lane.b32.xlu1 %v177_v12, %s577_s18  ;;  %288 = vrot.lane.b32.xlu0 %v176_v13, %s577_s18 }
  0x3a   : > { %292 = vrot.lane.b32.xlu2 %v178_v23, %s577_s18 }
  0x40   : > { %296 = vrot.lane.b32.xlu1 %v180_v15, %s577_s18  ;;  %294 = vrot.lane.b32.xlu0 %v179_v16, %s577_s18 }
  0x42   : > { %298 = vrot.lane.b32.xlu2 %v181_v26, %s577_s18 }
  0x48   : > { %302 = vrot.lane.b32.xlu1 %v183_v18, %s577_s18  ;;  %300 = vrot.lane.b32.xlu0 %v182_v19, %s577_s18 }
  0x4a   : > { %304 = vrot.lane.b32.xlu2 %v184_v29, %s577_s18 }
  0x50   : > { %308 = vrot.lane.b32.xlu1 %v186_v21, %s577_s18  ;;  %306 = vrot.lane.b32.xlu0 %v185_v22, %s577_s18 }
  0x52   : > { %310 = vrot.lane.b32.xlu2 %v187_v30, %s577_s18 }
  0x58   : > { %314 = vrot.lane.b32.xlu1 %v189_v24, %s577_s18  ;;  %312 = vrot.lane.b32.xlu0 %v188_v25, %s577_s18 }
  0x5a   : > { %316 = vrot.lane.b32.xlu2 %v190_v31, %s577_s18 }
  0x60   : > { %320 = vrot.lane.b32.xlu1 %v192_v27, %s577_s18  ;;  %318 = vrot.lane.b32.xlu0 %v191_v28, %s577_s18 }
  0x6c   : > { %v267_v32 = vpop.permute.xlu2 %266 }
  0x6d   : > { %496 = vst.msk [vmem:[%s614_s17 + $0x50] sm:$0xff] %vm193_vm0, %v267_v32 }
  0x74   : > { %v269_v33 = vpop.permute.xlu2 %268 }
  0x75   : > { %497 = vst.msk [vmem:[%s614_s17 + $0x58] sm:$0xff] %vm193_vm0, %v269_v33 }
  0x7c   : > { %v275_v34 = vpop.permute.xlu2 %274 }
  0x7d   : > { %500 = vst.msk [vmem:[%s614_s17 + $0x90] sm:$0xff] %vm193_vm0, %v275_v34 }
  0x82   : > { %v263_v35 = vpop.permute.xlu1 %262  ;;  %v259_v36 = vpop.permute.xlu0 %258 }
  0x83   : > { %494 = vst.msk [vmem:[%s614_s17 + $0x30] sm:$0xff] %vm193_vm0, %v263_v35 }
  0x84   : > { %492 = vst.msk [vmem:[%s614_s17 + $0x10] sm:$0xff] %vm193_vm0, %v259_v36  ;;  %v281_v37 = vpop.permute.xlu2 %280 }
  0x85   : > { %503 = vst.msk [vmem:[%s614_s17 + $0xb8] sm:$0xff] %vm193_vm0, %v281_v37 }
  0x8a   : > { %v265_v38 = vpop.permute.xlu1 %264  ;;  %v261_v39 = vpop.permute.xlu0 %260 }
  0x8b   : > { %495 = vst.msk [vmem:[%s614_s17 + $0x38] sm:$0xff] %vm193_vm0, %v265_v38 }
  0x8c   : > { %493 = vst.msk [vmem:[%s614_s17 + $0x18] sm:$0xff] %vm193_vm0, %v261_v39  ;;  %v287_v40 = vpop.permute.xlu2 %286 }
  0x8d   : > { %506 = vst.msk [vmem:[%s614_s17 + $0xf0] sm:$0xff] %vm193_vm0, %v287_v40 }
  0x92   : > { %v273_v41 = vpop.permute.xlu1 %272  ;;  %v271_v42 = vpop.permute.xlu0 %270 }
  0x93   : > { %499 = vst.msk [vmem:[%s614_s17 + $0x78] sm:$0xff] %vm193_vm0, %v273_v41 }
  0x94   : > { %498 = vst.msk [vmem:[%s614_s17 + $0x70] sm:$0xff] %vm193_vm0, %v271_v42  ;;  %v293_v43 = vpop.permute.xlu2 %292 }
  0x95   : > { %509 = vst.msk [vmem:[%s614_s17 + $0x118] sm:$0xff] %vm193_vm0, %v293_v43 }
  0x9a   : > { %v279_v44 = vpop.permute.xlu1 %278  ;;  %v277_v45 = vpop.permute.xlu0 %276 }
  0x9b   : > { %502 = vst.msk [vmem:[%s614_s17 + $0xb0] sm:$0xff] %vm193_vm0, %v279_v44 }
  0x9c   : > { %501 = vst.msk [vmem:[%s614_s17 + $0x98] sm:$0xff] %vm193_vm0, %v277_v45  ;;  %v299_v46 = vpop.permute.xlu2 %298 }
  0x9d   : > { %512 = vst.msk [vmem:[%s614_s17 + $0x150] sm:$0xff] %vm193_vm0, %v299_v46 }
  0xa2   : > { %v285_v47 = vpop.permute.xlu1 %284  ;;  %v283_v48 = vpop.permute.xlu0 %282 }
  0xa3   : > { %505 = vst.msk [vmem:[%s614_s17 + $0xd8] sm:$0xff] %vm193_vm0, %v285_v47 }
  0xa4   : > { %504 = vst.msk [vmem:[%s614_s17 + $0xd0] sm:$0xff] %vm193_vm0, %v283_v48  ;;  %v305_v49 = vpop.permute.xlu2 %304 }
  0xa5   : > { %515 = vst.msk [vmem:[%s614_s17 + $0x178] sm:$0xff] %vm193_vm0, %v305_v49 }
  0xaa   : > { %v291_v50 = vpop.permute.xlu1 %290  ;;  %v289_v51 = vpop.permute.xlu0 %288 }
  0xab   : > { %508 = vst.msk [vmem:[%s614_s17 + $0x110] sm:$0xff] %vm193_vm0, %v291_v50 }
  0xac   : > { %507 = vst.msk [vmem:[%s614_s17 + $0xf8] sm:$0xff] %vm193_vm0, %v289_v51  ;;  %v311_v52 = vpop.permute.xlu2 %310 }
  0xad   : > { %518 = vst.msk [vmem:[%s614_s17 + $0x1b0] sm:$0xff] %vm193_vm0, %v311_v52 }
  0xb2   : > { %v297_v53 = vpop.permute.xlu1 %296  ;;  %v295_v54 = vpop.permute.xlu0 %294 }
  0xb3   : > { %511 = vst.msk [vmem:[%s614_s17 + $0x138] sm:$0xff] %vm193_vm0, %v297_v53 }
  0xb4   : > { %510 = vst.msk [vmem:[%s614_s17 + $0x130] sm:$0xff] %vm193_vm0, %v295_v54  ;;  %v317_v55 = vpop.permute.xlu2 %316 }
  0xb5   : > { %521 = vst.msk [vmem:[%s614_s17 + $0x1d8] sm:$0xff] %vm193_vm0, %v317_v55 }
  0xba   : > { %v303_v56 = vpop.permute.xlu1 %302  ;;  %v301_v57 = vpop.permute.xlu0 %300 }
  0xbb   : > { %514 = vst.msk [vmem:[%s614_s17 + $0x170] sm:$0xff] %vm193_vm0, %v303_v56 }
  0xbc   : > { %513 = vst.msk [vmem:[%s614_s17 + $0x158] sm:$0xff] %vm193_vm0, %v301_v57 }
  0xc2   : > { %v309_v58 = vpop.permute.xlu1 %308  ;;  %v307_v59 = vpop.permute.xlu0 %306 }
  0xc3   : > { %517 = vst.msk [vmem:[%s614_s17 + $0x198] sm:$0xff] %vm193_vm0, %v309_v58 }
  0xc4   : > { %516 = vst.msk [vmem:[%s614_s17 + $0x190] sm:$0xff] %vm193_vm0, %v307_v59 }
  0xca   : > { %v315_v60 = vpop.permute.xlu1 %314  ;;  %v313_v61 = vpop.permute.xlu0 %312 }
  0xcb   : > { %520 = vst.msk [vmem:[%s614_s17 + $0x1d0] sm:$0xff] %vm193_vm0, %v315_v60 }
  0xcc   : > { %519 = vst.msk [vmem:[%s614_s17 + $0x1b8] sm:$0xff] %vm193_vm0, %v313_v61 }
  0xd2   : > { %v321_v62 = vpop.permute.xlu1 %320  ;;  %v319_v63 = vpop.permute.xlu0 %318 }
  0xd3   : > { %523 = vst.msk [vmem:[%s614_s17 + $0x1f8] sm:$0xff] %vm193_vm0, %v321_v62 }
  0xd4   : > { %522 = vst.msk [vmem:[%s614_s17 + $0x1f0] sm:$0xff] %vm193_vm0, %v319_v63 }
  0xd5 PF: > { %s11_s8 = sadd.s32 1, %s575_s8   ;;  %s819_s6 = smov %s571_s7 }
  0xd6   : > { %p8_p5 = scmp.ge.s32.totalorder %s11_s8, 4   ;;  %s820_s7 = smov %s822_s9 }
  0xd8   :  { %10 = sbr.rel (!%p8_p5) target bundleno = 2 (0x2), region = 55 }

</bundles_post_ra>
